<compile_context>
chip_gen: v7x
topology: tpu7x:2x2x1
jax: 0.10.0
libtpu: 0.0.40
codegen_flags: <defaults>
</compile_context>

<pallas_src>
import jax
import jax.numpy as jnp
from jax.experimental import pallas as pl
from jax.experimental.pallas import tpu as pltpu

_LANES = 128          # TPU lane width: lane-dense output => unmasked stores
_MAX_BLOCK_ROWS = 1024  # 1024x128 int32 = 512 KiB/buffer; ~2 MiB double-buffered


def _mask_kernel(maskid_ref, x_ref, mask_ref):
    # Pure VPU elementwise compare on a lane-dense (block_rows, 128) tile.
    mask_ref[...] = (x_ref[...] != maskid_ref[0]).astype(jnp.int32)


def _compute_mask(x, maskid):
    """mask = (x != maskid).astype(int32), computed with a lane-dense Pallas kernel."""
    orig_shape = x.shape
    x_flat = x.reshape(-1).astype(jnp.int32)
    n = x_flat.shape[0]

    # Lane-dense slab: (rows, 128) with rows a multiple of 8 sublanes and of
    # the row-block size so every grid step sees a full, aligned tile.
    rows = -(-n // _LANES)
    rows = -(-rows // 8) * 8
    block_rows = min(rows, _MAX_BLOCK_ROWS)
    rows = -(-rows // block_rows) * block_rows
    pad = rows * _LANES - n
    x_slab = jnp.pad(x_flat, (0, pad)).reshape(rows, _LANES)

    grid_spec = pltpu.PrefetchScalarGridSpec(
        num_scalar_prefetch=1,                      # maskid -> SMEM scalar
        grid=(rows // block_rows,),
        in_specs=[
            pl.BlockSpec((block_rows, _LANES), lambda i, mid: (i, 0)),
        ],
        out_specs=pl.BlockSpec((block_rows, _LANES), lambda i, mid: (i, 0)),
    )

    mask_slab = pl.pallas_call(
        _mask_kernel,
        out_shape=jax.ShapeDtypeStruct((rows, _LANES), jnp.int32),
        grid_spec=grid_spec,
        compiler_params=pltpu.CompilerParams(
            dimension_semantics=("parallel",),
        ),
    )(jnp.asarray([maskid], dtype=jnp.int32), x_slab)

    return mask_slab.reshape(-1)[:n].reshape(orig_shape)


def zero_word_emb_forward(x, *, dim, maskid):
    """Pallas/JAX implementation of ZeroWordEmb.forward.

    Args:
      x: integer array of token ids, arbitrary shape (e.g. (B, S)).
      dim: embedding dimension.
      maskid: int or None.

    Returns:
      (emb, mask): emb float32 of shape x.shape + (dim,); mask int32 of
      x.shape, or None if maskid is None.
    """
    # Zero embedding: produced by XLA directly (no kernel, no HBM round trip
    # forced by a pallas_call); consumers can fuse it away entirely.
    emb = jnp.zeros(x.shape + (dim,), dtype=jnp.float32)

    if maskid is None:
        return emb, None

    mask = _compute_mask(x, maskid)
    return emb, mask


if __name__ == "__main__":
    # Deterministic worddic: '<MASK>' -> 0, '<RARE>' -> 1, plus some words.
    worddic = {"<MASK>": 0, "<RARE>": 1, "the": 2, "cat": 3, "sat": 4, "mat": 5}
    dim = 50
    maskid = worddic["<MASK>"]  # ZeroWordEmb.__init__ sets maskid from worddic

    B, S = 2, 8
    key = jax.random.PRNGKey(0)
    x = jax.random.randint(key, (B, S), minval=0, maxval=len(worddic), dtype=jnp.int32)

    emb, mask = zero_word_emb_forward(x, dim=dim, maskid=maskid)
    emb = jax.block_until_ready(emb)
    mask = jax.block_until_ready(mask)

    # Reference check (pure JAX, mirrors the PyTorch semantics).
    ref_emb = jnp.zeros((B, S, dim), dtype=jnp.float32)
    ref_mask = (x != maskid).astype(jnp.int32)
    assert emb.shape == (B, S, dim) and emb.dtype == jnp.float32
    assert mask.shape == (B, S) and mask.dtype == jnp.int32
    assert jnp.array_equal(emb, ref_emb)
    assert jnp.array_equal(mask, ref_mask)

    # maskid=None path (no kernel, mask is None) — mirrors the module exactly.
    emb2, mask2 = zero_word_emb_forward(x, dim=dim, maskid=None)
    emb2 = jax.block_until_ready(emb2)
    assert mask2 is None and jnp.array_equal(emb2, ref_emb)

    print("KERNEL_OK")
</pallas_src>

<mosaic_0001>
module attributes {stable_mosaic.version = 11 : i64} {
  func.func @_mask_kernel(%arg0: i32, %arg1: memref<1xi32, #tpu.memory_space<smem>>, %arg2: memref<8x128xi32, #tpu.memory_space<vmem>>, %arg3: memref<8x128xi32, #tpu.memory_space<vmem>>) attributes {dimension_semantics = [#tpu.dimension_semantics<parallel>], iteration_bounds = array<i64: 1>, scalar_prefetch = 1 : i64, scratch_operands = 0 : i64, tpu.core_type = #tpu.core_type<tc>, window_params = [{transform_indices = @transform_0, window_bounds = array<i64: 8, 128>}, {transform_indices = @transform_1, window_bounds = array<i64: 8, 128>}]} {
    %c0 = arith.constant 0 : index
    %c0_0 = arith.constant 0 : index
    %0 = vector.load %arg2[%c0, %c0_0] : memref<8x128xi32, #tpu.memory_space<vmem>>, vector<8x128xi32>
    %c0_1 = arith.constant 0 : index
    %1 = memref.load %arg1[%c0_1] : memref<1xi32, #tpu.memory_space<smem>>
    %2 = vector.broadcast %1 : i32 to vector<8x128xi32>
    %3 = arith.cmpi ne, %0, %2 : vector<8x128xi32>
    %4 = arith.extui %3 : vector<8x128xi1> to vector<8x128xi32>
    %c0_2 = arith.constant 0 : index
    %c0_3 = arith.constant 0 : index
    %5 = vector.load %arg3[%c0_2, %c0_3] : memref<8x128xi32, #tpu.memory_space<vmem>>, vector<8x128xi32>
    tpu.vector_store %arg3[%c0_2, %c0_3], %4 {strides = array<i32>} : memref<8x128xi32, #tpu.memory_space<vmem>>, vector<8x128xi32>,
    return
  }
  func.func @transform_0(%arg0: i32, %arg1: memref<1xi32, #tpu.memory_space<smem>>) -> (i32, i32) {
    %c0_i32 = arith.constant 0 : i32
    %c0_i32_0 = arith.constant 0 : i32
    return %arg0, %c0_i32 : i32, i32
  }
  func.func @transform_1(%arg0: i32, %arg1: memref<1xi32, #tpu.memory_space<smem>>) -> (i32, i32) {
    %c0_i32 = arith.constant 0 : i32
    %c0_i32_0 = arith.constant 0 : i32
    return %arg0, %c0_i32 : i32, i32
  }
}

</mosaic_0001>

<bundles_post_ra>
// kernel: tpu_custom_call.1
= control target key start
LH: loop header
LB: loop body
LE: loop exit
PB: predicated region body
PF: predicated region fallthrough
CT: control target
= control target key end

     0   :  { %8 = vsyncpa [#allocation5], 0  ;;  %s140_s0 = inlined_call_operand.<no memory space> [shape: s32[1], index: 0, kind: input, shape index: {}]   ;;  %s141_s1 = inlined_call_operand.hbm [shape: s32[8,128], index: 1, kind: input, shape index: {}]   ;;  %s142_s2 = inlined_call_operand.hbm [shape: s32[8,128], index: 2, kind: output, shape index: {}]  }
   0x1   :  { %9 = vsyncpa [#allocation6], 0  ;;  %s95_s9 = smov [#allocation4]   ;;  %s47_s13 = scalar_lea.hbm %s141_s1, 128 }
   0x2   :  { %s16_s10 = sshll.u32 %s95_s9, 4  ;;  %p48_p0 = scmp.ne.s32.totalorder %s141_s1, %s47_s13  ;;  %s17_s10 = int_to_ptr.vmem [resolvable:$true] %s16_s10 }
   0x3   :  { %p51_p1 = scmp.lt.u32.totalorder %s47_s13, %s141_s1 }
   0x5   :  { %p53_p2 = pnand %p51_p1, %p48_p0 }
   0x7   :  { %56 = shalt.err (!%p53_p2)
}
   0x8   :  { %s57_s18 = scalar_lea.vmem %s17_s10, 128  ;;  %p62_p4 = scmp.lt.s32.totalorder %s17_s10, %s17_s10 }
   0x9   :  { %p58_p3 = scmp.ne.s32.totalorder %s17_s10, %s57_s18  ;;  %p63_p5 = scmp.lt.s32.totalorder %s57_s18, %s57_s18 }
   0xb   :  { %p64_p6 = por %p63_p5, %p62_p4 }
   0xd   :  { %p65_p7 = pnand %p64_p6, %p58_p3 }
   0xf   :  { %68 = shalt.err (!%p65_p7)
}
  0x10   :  { %19 = dma.hbm_to_vmem [thread:$0]  %s141_s1, 128, %s17_s10, [#allocation5]  }
  0x11   :  { %91 = dma.done.wait [#allocation5], 128  }
  0x12   :  { %92 = vsyncadd [#allocation5], 4294967168  ;;  %v25_v0 = vstv %s140_s0  ;;  %s96_s23 = smov [#allocation7]   ;;  %v23_v1 = vld [vmem:[#allocation4] sm:$0xff]  ;;  %v97_v2 = vmov 0  }
  0x13   :  { %s35_s24 = sshll.u32 %s96_s23, 4  ;;  %vm26_vm0 = vcmp.ne.s32.totalorder %v23_v1, %v25_v0  ;;  %s36_s24 = int_to_ptr.vmem [resolvable:$true] %s35_s24 }
  0x14   :  { %v27_v3 = vsel %vm26_vm0, 1, %v97_v2  ;;  %s69_s25 = scalar_lea.vmem %s36_s24, 128  ;;  %p74_p9 = scmp.lt.s32.totalorder %s36_s24, %s36_s24 }
  0x15   :  { %28 = vst [vmem:[#allocation7] sm:$0xff] %v27_v3  ;;  %p70_p8 = scmp.ne.s32.totalorder %s36_s24, %s69_s25  ;;  %p75_p10 = scmp.lt.s32.totalorder %s69_s25, %s69_s25 }
  0x17   :  { %p76_p11 = por %p75_p10, %p74_p9 }
  0x19   :  { %p77_p12 = pnand %p76_p11, %p70_p8 }
  0x1b   :  { %80 = shalt.err (!%p77_p12)
}
  0x1c   :  { %s81_s27 = scalar_lea.hbm %s142_s2, 128 }
  0x1d   :  { %p82_p13 = scmp.ne.s32.totalorder %s142_s2, %s81_s27  ;;  %p85_p0 = scmp.lt.u32.totalorder %s81_s27, %s142_s2 }
  0x1f   :  { %p87_p1 = pnand %p85_p0, %p82_p13 }
  0x21   :  { %90 = shalt.err (!%p87_p1)
}
  0x22   :  { %38 = dma.vmem_to_hbm [thread:$0]  %s36_s24, 128, %s142_s2, [#allocation6]  }
  0x23   :  { %93 = dma.done.wait [#allocation6], 128  }
  0x24   :  { %94 = vsyncadd [#allocation6], 4294967168 }
  0x25   :  { %42 = vsyncpa [#allocation5], 1 }
  0x26   :  { %43 = vsyncpa [#allocation6], 1 }

</bundles_post_ra>
